<compile_context>
chip_gen: v7x
topology: tpu7x:2x2x1
jax: 0.10.0
libtpu: 0.0.40
codegen_flags: <defaults>
</compile_context>

<pallas_src>
import functools
import math

import jax
import jax.numpy as jnp
from jax import lax
from jax.experimental import pallas as pl
from jax.experimental.pallas import tpu as pltpu


def _mha_kernel(num_heads, head_dim, has_rn, has_aa, has_am, *refs):
    """Fused MHA forward for one (batch, query-tile) grid step."""
    idx = 0
    x_ref = refs[idx]; idx += 1          # (1, N, E)    compute dtype
    wqkv_ref = refs[idx]; idx += 1       # (E, 3E)      compute dtype [Q | K | V]
    bqkv_ref = refs[idx]; idx += 1       # (1, 3E)      f32
    wo_ref = refs[idx]; idx += 1         # (E, E)       compute dtype
    bo_ref = refs[idx]; idx += 1         # (1, E)       f32
    rn_ref = aa_ref = am_ref = None
    if has_rn:
        rn_ref = refs[idx]; idx += 1     # (1, N, 1)    f32
    if has_aa:
        aa_ref = refs[idx]; idx += 1     # (H, TQ, N) or (1, H, TQ, N)
    if has_am:
        am_ref = refs[idx]; idx += 1     # (H, TQ, N) or (1, H, TQ, N)
    o_ref = refs[idx]; idx += 1          # (1, TQ, E)
    q_scr = refs[idx]; idx += 1          # (H, N, hd)   compute dtype (pre-scaled)
    k_scr = refs[idx]; idx += 1          # (H, N, hd)   compute dtype
    v_scr = refs[idx]; idx += 1          # (H, N, hd)   compute dtype

    cdt = wqkv_ref.dtype
    E = num_heads * head_dim
    tq = o_ref.shape[1]
    qi = pl.program_id(1)
    scale = 1.0 / math.sqrt(head_dim)

    # --- Q / K / V for the whole sequence: computed once per batch element. ---
    @pl.when(qi == 0)
    def _():
        x = x_ref[0]                                                     # (N, E)
        qkv = jnp.dot(x, wqkv_ref[...],
                      preferred_element_type=jnp.float32) + bqkv_ref[...]  # (N, 3E) f32
        q_all = qkv[:, :E] * scale
        if has_rn:
            # real_nodes scales score query rows; folding into Q is identical:
            # ((Q*rn) @ K^T) == (Q @ K^T) * rn_rows.
            q_all = q_all * rn_ref[0].astype(jnp.float32)                # (N, E)
        for h in range(num_heads):
            lo = h * head_dim
            q_scr[h] = q_all[:, lo:lo + head_dim].astype(cdt)
            k_scr[h] = qkv[:, E + lo:E + lo + head_dim].astype(cdt)
            v_scr[h] = qkv[:, 2 * E + lo:2 * E + lo + head_dim].astype(cdt)

    q_start = pl.multiple_of(qi * tq, tq)

    def _attn_term(ref, h):
        if len(ref.shape) == 4:                       # (1, H, TQ, N) per-batch
            return ref[0, h].astype(jnp.float32)
        return ref[h].astype(jnp.float32)             # (H, TQ, N) batch-shared

    acc = jnp.zeros((tq, E), jnp.float32)
    for h in range(num_heads):                        # static unrolled head loop
        lo = h * head_dim
        q_h = q_scr[h, pl.ds(q_start, tq), :]         # (TQ, hd)
        k_h = k_scr[h]                                # (N, hd)
        v_h = v_scr[h]                                # (N, hd)

        # scores = q_h @ k_h^T (contract over hd; no explicit transpose)
        s = lax.dot_general(q_h, k_h, (((1,), (1,)), ((), ())),
                            preferred_element_type=jnp.float32)          # (TQ, N)
        if has_aa:
            s = s + _attn_term(aa_ref, h)

        # softmax over keys (f32), reciprocal computed once per row
        s = s - jnp.max(s, axis=-1, keepdims=True)
        e = jnp.exp(s)
        p = e * pl.reciprocal(jnp.sum(e, axis=-1, keepdims=True))
        if has_am:
            p = p * _attn_term(am_ref, h)

        o_h = jnp.dot(p.astype(cdt), v_h,
                      preferred_element_type=jnp.float32)                # (TQ, hd)
        # Fused output projection: no concat of head outputs.
        acc = acc + jnp.dot(o_h.astype(cdt), wo_ref[lo:lo + head_dim, :],
                            preferred_element_type=jnp.float32)

    o_ref[0] = (acc + bo_ref[...]).astype(o_ref.dtype)


def multi_head_attention(X, params, num_heads, real_nodes=None,
                         attn_mult=None, attn_add=None, *,
                         block_q=None, compute_dtype=jnp.float32):
    """Pallas forward for MultiHeadAttentionLayer.

    X: (B, N, E).  params: (Wq, bq, Wk, bk, Wv, bv, Wo, bo) with W shaped
    (out, in) like nn.Linear and b shaped (out,).
    compute_dtype: matmul operand dtype (use jnp.bfloat16 on v6e/v7x);
    accumulation and softmax are always f32.
    """
    B, N, E = X.shape
    assert E % num_heads == 0, "embed_dim must be divisible by num_heads"
    head_dim = E // num_heads
    wq, bq, wk, bk, wv, bv, wo, bo = params

    if block_q is None:
        block_q = 128 if N % 128 == 0 else N
    block_q = min(block_q, N)
    assert N % block_q == 0 and (block_q % 8 == 0 or block_q == N)
    n_q = N // block_q

    cdt = jnp.dtype(compute_dtype)
    out_dtype = X.dtype

    # Weights pre-transposed to (in, out); Q, K, V weights fused into one matmul.
    wqkv_t = jnp.concatenate([wq.T, wk.T, wv.T], axis=1).astype(cdt)   # (E, 3E)
    bqkv = jnp.concatenate([bq, bk, bv]).reshape(1, 3 * E).astype(jnp.float32)
    wo_t = wo.T.astype(cdt)
    bo2 = bo.reshape(1, E).astype(jnp.float32)

    xc = X.astype(cdt)
    args = [xc, wqkv_t, bqkv, wo_t, bo2]
    in_specs = [
        pl.BlockSpec((1, N, E), lambda b, qi: (b, 0, 0)),            # full-seq x
        pl.BlockSpec((E, 3 * E), lambda b, qi: (0, 0)),              # Wqkv
        pl.BlockSpec((1, 3 * E), lambda b, qi: (0, 0)),              # bqkv
        pl.BlockSpec((E, E), lambda b, qi: (0, 0)),                  # Wo
        pl.BlockSpec((1, E), lambda b, qi: (0, 0)),                  # bo
    ]

    has_rn = real_nodes is not None
    has_aa = attn_add is not None
    has_am = attn_mult is not None

    if has_rn:
        rn = jnp.asarray(real_nodes, jnp.float32).reshape(B, N, 1)
        args.append(rn)
        in_specs.append(pl.BlockSpec((1, N, 1), lambda b, qi: (b, 0, 0)))

    def _prep_attn_term(t):
        t = jnp.asarray(t, jnp.float32)
        if t.ndim == 4 and t.shape[0] != 1:
            # Genuinely per-batch: keep the batch axis and index it with `b`.
            t = jnp.broadcast_to(t, (B, num_heads, N, N))
            spec = pl.BlockSpec((1, num_heads, block_q, N),
                                lambda b, qi: (b, 0, qi, 0))
        else:
            # Batch-shared: single (H, N, N) copy, reused for every batch step.
            if t.ndim == 4:
                t = t[0]
            t = jnp.broadcast_to(t, (num_heads, N, N))
            spec = pl.BlockSpec((num_heads, block_q, N),
                                lambda b, qi: (0, qi, 0))
        return t, spec

    if has_aa:
        t, spec = _prep_attn_term(attn_add)
        args.append(t); in_specs.append(spec)
    if has_am:
        t, spec = _prep_attn_term(attn_mult)
        args.append(t); in_specs.append(spec)

    # Rough VMEM working-set estimate (double-buffered blocks + scratch).
    csz = cdt.itemsize
    osz = jnp.dtype(out_dtype).itemsize
    hd_lanes = ((head_dim + 127) // 128) * 128
    n_lanes = ((N + 127) // 128) * 128
    e3_lanes = ((3 * E + 127) // 128) * 128
    est = (2 * N * E * csz                               # x block
           + (E * 3 * E + E * E) * csz + (4 * E) * 4     # weights + biases
           + 3 * num_heads * N * hd_lanes * csz          # Q/K/V scratch (lane padded)
           + N * e3_lanes * 4                            # qkv f32 temporary
           + 2 * block_q * E * osz                       # output block
           + 6 * block_q * n_lanes * 4)                  # score temporaries
    if has_aa:
        est += 2 * num_heads * block_q * N * 4
    if has_am:
        est += 2 * num_heads * block_q * N * 4
    vmem_limit = int(min(max(2 * est, 32 * 1024 * 1024), 64 * 1024 * 1024))

    kernel = functools.partial(_mha_kernel, num_heads, head_dim,
                               has_rn, has_aa, has_am)

    return pl.pallas_call(
        kernel,
        out_shape=jax.ShapeDtypeStruct((B, N, E), out_dtype),
        grid=(B, n_q),
        in_specs=in_specs,
        out_specs=pl.BlockSpec((1, block_q, E), lambda b, qi: (b, qi, 0)),
        scratch_shapes=[pltpu.VMEM((num_heads, N, head_dim), cdt),
                        pltpu.VMEM((num_heads, N, head_dim), cdt),
                        pltpu.VMEM((num_heads, N, head_dim), cdt)],
        compiler_params=pltpu.CompilerParams(
            dimension_semantics=("parallel", "arbitrary"),
            vmem_limit_bytes=vmem_limit),
    )(*args)


def _reference(X, params, num_heads, real_nodes=None, attn_mult=None,
               attn_add=None):
    """Pure-JAX mirror of the PyTorch forward (dropout = identity)."""
    B, N, E = X.shape
    hd = E // num_heads
    wq, bq, wk, bk, wv, bv, wo, bo = params
    Q = X @ wq.T + bq
    K = X @ wk.T + bk
    V = X @ wv.T + bv

    def split(t):
        return t.reshape(B, N, num_heads, hd).transpose(0, 2, 1, 3)

    Qh, Kh, Vh = split(Q), split(K), split(V)
    score = jnp.einsum('bhnd,bhmd->bhnm', Qh, Kh) / math.sqrt(hd)
    if real_nodes is not None:
        score = score * real_nodes[:, None, :, None]
    if attn_add is not None:
        score = score + attn_add
    score = jax.nn.softmax(score, axis=-1)
    if attn_mult is not None:
        score = score * attn_mult
    out = jnp.einsum('bhnm,bhmd->bhnd', score, Vh)
    out = out.transpose(0, 2, 1, 3).reshape(B, N, E)
    return out @ wo.T + bo


if __name__ == "__main__":
    B, N, E, H = 2, 16, 32, 4

    key = jax.random.PRNGKey(0)
    keys = jax.random.split(key, 12)
    X = jax.random.normal(keys[0], (B, N, E), jnp.float32)

    def init_linear(kw, kb, fan_in, fan_out):
        bound = 1.0 / math.sqrt(fan_in)
        W = jax.random.uniform(kw, (fan_out, fan_in), jnp.float32, -bound, bound)
        b = jax.random.uniform(kb, (fan_out,), jnp.float32, -bound, bound)
        return W, b

    Wq, bq = init_linear(keys[1], keys[2], E, E)
    Wk, bk = init_linear(keys[3], keys[4], E, E)
    Wv, bv = init_linear(keys[5], keys[6], E, E)
    Wo, bo = init_linear(keys[7], keys[8], E, E)
    params = (Wq, bq, Wk, bk, Wv, bv, Wo, bo)

    # 1) plain path, f32 compute, query tiling exercised (block_q=8 -> 2 tiles)
    out = multi_head_attention(X, params, num_heads=H, block_q=8)
    out = jax.block_until_ready(out)
    ref = _reference(X, params, num_heads=H)
    assert out.shape == (B, N, E)
    assert jnp.allclose(out, ref, rtol=5e-4, atol=5e-4), "mismatch (plain path)"

    # 2) real_nodes + batch-shared attn_add + per-batch attn_mult
    real_nodes = (jax.random.uniform(keys[9], (B, N)) > 0.25).astype(jnp.float32)
    attn_add = 0.5 * jax.random.normal(keys[10], (H, N, N), jnp.float32)
    attn_mult = 1.0 + 0.1 * jax.random.normal(keys[11], (B, H, N, N), jnp.float32)
    out2 = multi_head_attention(X, params, num_heads=H, real_nodes=real_nodes,
                                attn_mult=attn_mult, attn_add=attn_add,
                                block_q=8)
    out2 = jax.block_until_ready(out2)
    ref2 = _reference(X, params, H, real_nodes, attn_mult, attn_add)
    assert jnp.allclose(out2, ref2, rtol=5e-4, atol=5e-4), "mismatch (masked path)"

    # 3) bf16 MXU operands (v6e/v7x fast path), f32 accumulation & softmax
    out3 = multi_head_attention(X, params, num_heads=H, block_q=8,
                                compute_dtype=jnp.bfloat16)
    out3 = jax.block_until_ready(out3)
    assert jnp.allclose(out3, ref, rtol=5e-2, atol=5e-2), "mismatch (bf16 path)"

    print("KERNEL_OK")
</pallas_src>

<mosaic_0001>
module attributes {stable_mosaic.version = 11 : i64} {
  func.func @_mha_kernel(%arg0: i32, %arg1: i32, %arg2: memref<1x16x32xf32, #tpu.memory_space<vmem>>, %arg3: memref<32x96xf32, #tpu.memory_space<vmem>>, %arg4: memref<1x96xf32, #tpu.memory_space<vmem>>, %arg5: memref<32x32xf32, #tpu.memory_space<vmem>>, %arg6: memref<1x32xf32, #tpu.memory_space<vmem>>, %arg7: memref<1x8x32xf32, #tpu.memory_space<vmem>>, %arg8: memref<4x16x8xf32, #tpu.memory_space<vmem>>, %arg9: memref<4x16x8xf32, #tpu.memory_space<vmem>>, %arg10: memref<4x16x8xf32, #tpu.memory_space<vmem>>) attributes {dimension_semantics = [#tpu.dimension_semantics<parallel>, #tpu.dimension_semantics<arbitrary>], iteration_bounds = array<i64: 2, 2>, scalar_prefetch = 0 : i64, scratch_operands = 3 : i64, tpu.core_type = #tpu.core_type<tc>, window_params = [{transform_indices = @transform_0, window_bounds = array<i64: 1, 16, 32>}, {pipeline_mode = #tpu.pipeline_mode<synchronous>, transform_indices = @transform_1, window_bounds = array<i64: 32, 96>}, {pipeline_mode = #tpu.pipeline_mode<synchronous>, transform_indices = @transform_2, window_bounds = array<i64: 1, 96>}, {pipeline_mode = #tpu.pipeline_mode<synchronous>, transform_indices = @transform_3, window_bounds = array<i64: 32, 32>}, {pipeline_mode = #tpu.pipeline_mode<synchronous>, transform_indices = @transform_4, window_bounds = array<i64: 1, 32>}, {transform_indices = @transform_5, window_bounds = array<i64: 1, 8, 32>}]} {
    %c0_i32 = arith.constant 0 : i32
    %0 = arith.cmpi eq, %arg1, %c0_i32 : i32
    %1 = arith.extui %0 : i1 to i32
    %c0_i32_0 = arith.constant 0 : i32
    %2 = arith.cmpi ne, %1, %c0_i32_0 : i32
    scf.if %2 {
      %c0_59 = arith.constant 0 : index
      %c0_60 = arith.constant 0 : index
      %c0_61 = arith.constant 0 : index
      %100 = vector.load %arg2[%c0_59, %c0_60, %c0_61] : memref<1x16x32xf32, #tpu.memory_space<vmem>>, vector<1x16x32xf32>
      %101 = vector.shape_cast %100 : vector<1x16x32xf32> to vector<16x32xf32>
      %c0_62 = arith.constant 0 : index
      %c0_63 = arith.constant 0 : index
      %102 = vector.load %arg3[%c0_62, %c0_63] : memref<32x96xf32, #tpu.memory_space<vmem>>, vector<32x96xf32>
      %cst_64 = arith.constant dense<0.000000e+00> : vector<16x96xf32>
      %103 = tpu.matmul %101, %102, %cst_64 {dimension_numbers = #tpu.dot_dimension_numbers<[1], [0], [0], [1], [0, 0, 1, 1], [], []>} : vector<16x32xf32>, vector<32x96xf32>, vector<16x96xf32> -> vector<16x96xf32>
      %c0_65 = arith.constant 0 : index
      %c0_66 = arith.constant 0 : index
      %104 = vector.load %arg4[%c0_65, %c0_66] : memref<1x96xf32, #tpu.memory_space<vmem>>, vector<1x96xf32>
      %105 = vector.broadcast %104 : vector<1x96xf32> to vector<16x96xf32>
      %106 = arith.addf %103, %105 : vector<16x96xf32>
      %107 = vector.extract_strided_slice %106 {offsets = [0, 0], sizes = [16, 32], strides = [1, 1]} : vector<16x96xf32> to vector<16x32xf32>
      %cst_67 = arith.constant 0.353553385 : f32
      %108 = vector.broadcast %cst_67 : f32 to vector<16x32xf32>
      %109 = arith.mulf %107, %108 : vector<16x32xf32>
      %110 = vector.extract_strided_slice %109 {offsets = [0, 0], sizes = [16, 8], strides = [1, 1]} : vector<16x32xf32> to vector<16x8xf32>
      %c0_68 = arith.constant 0 : index
      %c0_69 = arith.constant 0 : index
      %c0_70 = arith.constant 0 : index
      %111 = vector.load %arg8[%c0_68, %c0_69, %c0_70] : memref<4x16x8xf32, #tpu.memory_space<vmem>>, vector<1x16x8xf32>
      %112 = vector.shape_cast %111 : vector<1x16x8xf32> to vector<16x8xf32>
      %113 = vector.shape_cast %110 : vector<16x8xf32> to vector<1x16x8xf32>
      tpu.vector_store %arg8[%c0_68, %c0_69, %c0_70], %113 {strides = array<i32>} : memref<4x16x8xf32, #tpu.memory_space<vmem>>, vector<1x16x8xf32>,
      %114 = vector.extract_strided_slice %106 {offsets = [0, 32], sizes = [16, 8], strides = [1, 1]} : vector<16x96xf32> to vector<16x8xf32>
      %c0_71 = arith.constant 0 : index
      %c0_72 = arith.constant 0 : index
      %c0_73 = arith.constant 0 : index
      %115 = vector.load %arg9[%c0_71, %c0_72, %c0_73] : memref<4x16x8xf32, #tpu.memory_space<vmem>>, vector<1x16x8xf32>
      %116 = vector.shape_cast %115 : vector<1x16x8xf32> to vector<16x8xf32>
      %117 = vector.shape_cast %114 : vector<16x8xf32> to vector<1x16x8xf32>
      tpu.vector_store %arg9[%c0_71, %c0_72, %c0_73], %117 {strides = array<i32>} : memref<4x16x8xf32, #tpu.memory_space<vmem>>, vector<1x16x8xf32>,
      %118 = vector.extract_strided_slice %106 {offsets = [0, 64], sizes = [16, 8], strides = [1, 1]} : vector<16x96xf32> to vector<16x8xf32>
      %c0_74 = arith.constant 0 : index
      %c0_75 = arith.constant 0 : index
      %c0_76 = arith.constant 0 : index
      %119 = vector.load %arg10[%c0_74, %c0_75, %c0_76] : memref<4x16x8xf32, #tpu.memory_space<vmem>>, vector<1x16x8xf32>
      %120 = vector.shape_cast %119 : vector<1x16x8xf32> to vector<16x8xf32>
      %121 = vector.shape_cast %118 : vector<16x8xf32> to vector<1x16x8xf32>
      tpu.vector_store %arg10[%c0_74, %c0_75, %c0_76], %121 {strides = array<i32>} : memref<4x16x8xf32, #tpu.memory_space<vmem>>, vector<1x16x8xf32>,
      %122 = vector.extract_strided_slice %109 {offsets = [0, 8], sizes = [16, 8], strides = [1, 1]} : vector<16x32xf32> to vector<16x8xf32>
      %c1_77 = arith.constant 1 : index
      %c0_78 = arith.constant 0 : index
      %c0_79 = arith.constant 0 : index
      %123 = vector.load %arg8[%c1_77, %c0_78, %c0_79] : memref<4x16x8xf32, #tpu.memory_space<vmem>>, vector<1x16x8xf32>
      %124 = vector.shape_cast %123 : vector<1x16x8xf32> to vector<16x8xf32>
      %125 = vector.shape_cast %122 : vector<16x8xf32> to vector<1x16x8xf32>
      tpu.vector_store %arg8[%c1_77, %c0_78, %c0_79], %125 {strides = array<i32>} : memref<4x16x8xf32, #tpu.memory_space<vmem>>, vector<1x16x8xf32>,
      %126 = vector.extract_strided_slice %106 {offsets = [0, 40], sizes = [16, 8], strides = [1, 1]} : vector<16x96xf32> to vector<16x8xf32>
      %c1_80 = arith.constant 1 : index
      %c0_81 = arith.constant 0 : index
      %c0_82 = arith.constant 0 : index
      %127 = vector.load %arg9[%c1_80, %c0_81, %c0_82] : memref<4x16x8xf32, #tpu.memory_space<vmem>>, vector<1x16x8xf32>
      %128 = vector.shape_cast %127 : vector<1x16x8xf32> to vector<16x8xf32>
      %129 = vector.shape_cast %126 : vector<16x8xf32> to vector<1x16x8xf32>
      tpu.vector_store %arg9[%c1_80, %c0_81, %c0_82], %129 {strides = array<i32>} : memref<4x16x8xf32, #tpu.memory_space<vmem>>, vector<1x16x8xf32>,
      %130 = vector.extract_strided_slice %106 {offsets = [0, 72], sizes = [16, 8], strides = [1, 1]} : vector<16x96xf32> to vector<16x8xf32>
      %c1_83 = arith.constant 1 : index
      %c0_84 = arith.constant 0 : index
      %c0_85 = arith.constant 0 : index
      %131 = vector.load %arg10[%c1_83, %c0_84, %c0_85] : memref<4x16x8xf32, #tpu.memory_space<vmem>>, vector<1x16x8xf32>
      %132 = vector.shape_cast %131 : vector<1x16x8xf32> to vector<16x8xf32>
      %133 = vector.shape_cast %130 : vector<16x8xf32> to vector<1x16x8xf32>
      tpu.vector_store %arg10[%c1_83, %c0_84, %c0_85], %133 {strides = array<i32>} : memref<4x16x8xf32, #tpu.memory_space<vmem>>, vector<1x16x8xf32>,
      %134 = vector.extract_strided_slice %109 {offsets = [0, 16], sizes = [16, 8], strides = [1, 1]} : vector<16x32xf32> to vector<16x8xf32>
      %c2_86 = arith.constant 2 : index
      %c0_87 = arith.constant 0 : index
      %c0_88 = arith.constant 0 : index
      %135 = vector.load %arg8[%c2_86, %c0_87, %c0_88] : memref<4x16x8xf32, #tpu.memory_space<vmem>>, vector<1x16x8xf32>
      %136 = vector.shape_cast %135 : vector<1x16x8xf32> to vector<16x8xf32>
      %137 = vector.shape_cast %134 : vector<16x8xf32> to vector<1x16x8xf32>
      tpu.vector_store %arg8[%c2_86, %c0_87, %c0_88], %137 {strides = array<i32>} : memref<4x16x8xf32, #tpu.memory_space<vmem>>, vector<1x16x8xf32>,
      %138 = vector.extract_strided_slice %106 {offsets = [0, 48], sizes = [16, 8], strides = [1, 1]} : vector<16x96xf32> to vector<16x8xf32>
      %c2_89 = arith.constant 2 : index
      %c0_90 = arith.constant 0 : index
      %c0_91 = arith.constant 0 : index
      %139 = vector.load %arg9[%c2_89, %c0_90, %c0_91] : memref<4x16x8xf32, #tpu.memory_space<vmem>>, vector<1x16x8xf32>
      %140 = vector.shape_cast %139 : vector<1x16x8xf32> to vector<16x8xf32>
      %141 = vector.shape_cast %138 : vector<16x8xf32> to vector<1x16x8xf32>
      tpu.vector_store %arg9[%c2_89, %c0_90, %c0_91], %141 {strides = array<i32>} : memref<4x16x8xf32, #tpu.memory_space<vmem>>, vector<1x16x8xf32>,
      %142 = vector.extract_strided_slice %106 {offsets = [0, 80], sizes = [16, 8], strides = [1, 1]} : vector<16x96xf32> to vector<16x8xf32>
      %c2_92 = arith.constant 2 : index
      %c0_93 = arith.constant 0 : index
      %c0_94 = arith.constant 0 : index
      %143 = vector.load %arg10[%c2_92, %c0_93, %c0_94] : memref<4x16x8xf32, #tpu.memory_space<vmem>>, vector<1x16x8xf32>
      %144 = vector.shape_cast %143 : vector<1x16x8xf32> to vector<16x8xf32>
      %145 = vector.shape_cast %142 : vector<16x8xf32> to vector<1x16x8xf32>
      tpu.vector_store %arg10[%c2_92, %c0_93, %c0_94], %145 {strides = array<i32>} : memref<4x16x8xf32, #tpu.memory_space<vmem>>, vector<1x16x8xf32>,
      %146 = vector.extract_strided_slice %109 {offsets = [0, 24], sizes = [16, 8], strides = [1, 1]} : vector<16x32xf32> to vector<16x8xf32>
      %c3_95 = arith.constant 3 : index
      %c0_96 = arith.constant 0 : index
      %c0_97 = arith.constant 0 : index
      %147 = vector.load %arg8[%c3_95, %c0_96, %c0_97] : memref<4x16x8xf32, #tpu.memory_space<vmem>>, vector<1x16x8xf32>
      %148 = vector.shape_cast %147 : vector<1x16x8xf32> to vector<16x8xf32>
      %149 = vector.shape_cast %146 : vector<16x8xf32> to vector<1x16x8xf32>
      tpu.vector_store %arg8[%c3_95, %c0_96, %c0_97], %149 {strides = array<i32>} : memref<4x16x8xf32, #tpu.memory_space<vmem>>, vector<1x16x8xf32>,
      %150 = vector.extract_strided_slice %106 {offsets = [0, 56], sizes = [16, 8], strides = [1, 1]} : vector<16x96xf32> to vector<16x8xf32>
      %c3_98 = arith.constant 3 : index
      %c0_99 = arith.constant 0 : index
      %c0_100 = arith.constant 0 : index
      %151 = vector.load %arg9[%c3_98, %c0_99, %c0_100] : memref<4x16x8xf32, #tpu.memory_space<vmem>>, vector<1x16x8xf32>
      %152 = vector.shape_cast %151 : vector<1x16x8xf32> to vector<16x8xf32>
      %153 = vector.shape_cast %150 : vector<16x8xf32> to vector<1x16x8xf32>
      tpu.vector_store %arg9[%c3_98, %c0_99, %c0_100], %153 {strides = array<i32>} : memref<4x16x8xf32, #tpu.memory_space<vmem>>, vector<1x16x8xf32>,
      %154 = vector.extract_strided_slice %106 {offsets = [0, 88], sizes = [16, 8], strides = [1, 1]} : vector<16x96xf32> to vector<16x8xf32>
      %c3_101 = arith.constant 3 : index
      %c0_102 = arith.constant 0 : index
      %c0_103 = arith.constant 0 : index
      %155 = vector.load %arg10[%c3_101, %c0_102, %c0_103] : memref<4x16x8xf32, #tpu.memory_space<vmem>>, vector<1x16x8xf32>
      %156 = vector.shape_cast %155 : vector<1x16x8xf32> to vector<16x8xf32>
      %157 = vector.shape_cast %154 : vector<16x8xf32> to vector<1x16x8xf32>
      tpu.vector_store %arg10[%c3_101, %c0_102, %c0_103], %157 {strides = array<i32>} : memref<4x16x8xf32, #tpu.memory_space<vmem>>, vector<1x16x8xf32>,
    } else {
    }
    %c8_i32 = arith.constant 8 : i32
    %3 = arith.muli %arg1, %c8_i32 : i32
    %4 = tpu.assume_multiple %3, 8 : i32
    %cst = arith.constant 0.000000e+00 : f32
    %5 = vector.broadcast %cst : f32 to vector<8x32xf32>
    %c0 = arith.constant 0 : index
    %6 = arith.index_cast %4 : i32 to index
    %c0_1 = arith.constant 0 : index
    %7 = vector.load %arg8[%c0, %6, %c0_1] : memref<4x16x8xf32, #tpu.memory_space<vmem>>, vector<1x8x8xf32>
    %8 = vector.shape_cast %7 : vector<1x8x8xf32> to vector<8x8xf32>
    %c0_2 = arith.constant 0 : index
    %c0_3 = arith.constant 0 : index
    %c0_4 = arith.constant 0 : index
    %9 = vector.load %arg9[%c0_2, %c0_3, %c0_4] : memref<4x16x8xf32, #tpu.memory_space<vmem>>, vector<1x16x8xf32>
    %10 = vector.shape_cast %9 : vector<1x16x8xf32> to vector<16x8xf32>
    %c0_5 = arith.constant 0 : index
    %c0_6 = arith.constant 0 : index
    %c0_7 = arith.constant 0 : index
    %11 = vector.load %arg10[%c0_5, %c0_6, %c0_7] : memref<4x16x8xf32, #tpu.memory_space<vmem>>, vector<1x16x8xf32>
    %12 = vector.shape_cast %11 : vector<1x16x8xf32> to vector<16x8xf32>
    %cst_8 = arith.constant dense<0.000000e+00> : vector<8x16xf32>
    %13 = tpu.matmul %8, %10, %cst_8 {dimension_numbers = #tpu.dot_dimension_numbers<[1], [1], [0], [0], [0, 0, 1, 0], [], []>} : vector<8x8xf32>, vector<16x8xf32>, vector<8x16xf32> -> vector<8x16xf32>
    %cst_9 = arith.constant dense<0xFF800000> : vector<8xf32>
    %14 = vector.multi_reduction <maximumf>, %13, %cst_9 [1] : vector<8x16xf32> to vector<8xf32>
    %15 = vector.shape_cast %14 : vector<8xf32> to vector<8x1xf32>
    %16 = vector.broadcast %15 : vector<8x1xf32> to vector<8x16xf32>
    %17 = arith.subf %13, %16 : vector<8x16xf32>
    %18 = math.exp %17 : vector<8x16xf32>
    %cst_10 = arith.constant dense<0.000000e+00> : vector<8xf32>
    %19 = vector.multi_reduction <add>, %18, %cst_10 [1] : vector<8x16xf32> to vector<8xf32>
    %20 = vector.shape_cast %19 : vector<8xf32> to vector<8x1xf32>
    %21 = tpu.reciprocal %20 : vector<8x1xf32> -> vector<8x1xf32>
    %22 = vector.broadcast %21 : vector<8x1xf32> to vector<8x16xf32>
    %23 = arith.mulf %18, %22 : vector<8x16xf32>
    %cst_11 = arith.constant dense<0.000000e+00> : vector<8x8xf32>
    %24 = tpu.matmul %23, %12, %cst_11 {dimension_numbers = #tpu.dot_dimension_numbers<[1], [0], [0], [1], [0, 0, 1, 1], [], []>} : vector<8x16xf32>, vector<16x8xf32>, vector<8x8xf32> -> vector<8x8xf32>
    %c0_12 = arith.constant 0 : index
    %c0_13 = arith.constant 0 : index
    %25 = vector.load %arg5[%c0_12, %c0_13] : memref<32x32xf32, #tpu.memory_space<vmem>>, vector<8x32xf32>
    %cst_14 = arith.constant dense<0.000000e+00> : vector<8x32xf32>
    %26 = tpu.matmul %24, %25, %cst_14 {dimension_numbers = #tpu.dot_dimension_numbers<[1], [0], [0], [1], [0, 0, 1, 1], [], []>} : vector<8x8xf32>, vector<8x32xf32>, vector<8x32xf32> -> vector<8x32xf32>
    %27 = arith.addf %5, %26 : vector<8x32xf32>
    %c1 = arith.constant 1 : index
    %28 = arith.index_cast %4 : i32 to index
    %c0_15 = arith.constant 0 : index
    %29 = vector.load %arg8[%c1, %28, %c0_15] : memref<4x16x8xf32, #tpu.memory_space<vmem>>, vector<1x8x8xf32>
    %30 = vector.shape_cast %29 : vector<1x8x8xf32> to vector<8x8xf32>
    %c1_16 = arith.constant 1 : index
    %c0_17 = arith.constant 0 : index
    %c0_18 = arith.constant 0 : index
    %31 = vector.load %arg9[%c1_16, %c0_17, %c0_18] : memref<4x16x8xf32, #tpu.memory_space<vmem>>, vector<1x16x8xf32>
    %32 = vector.shape_cast %31 : vector<1x16x8xf32> to vector<16x8xf32>
    %c1_19 = arith.constant 1 : index
    %c0_20 = arith.constant 0 : index
    %c0_21 = arith.constant 0 : index
    %33 = vector.load %arg10[%c1_19, %c0_20, %c0_21] : memref<4x16x8xf32, #tpu.memory_space<vmem>>, vector<1x16x8xf32>
    %34 = vector.shape_cast %33 : vector<1x16x8xf32> to vector<16x8xf32>
    %cst_22 = arith.constant dense<0.000000e+00> : vector<8x16xf32>
    %35 = tpu.matmul %30, %32, %cst_22 {dimension_numbers = #tpu.dot_dimension_numbers<[1], [1], [0], [0], [0, 0, 1, 0], [], []>} : vector<8x8xf32>, vector<16x8xf32>, vector<8x16xf32> -> vector<8x16xf32>
    %cst_23 = arith.constant dense<0xFF800000> : vector<8xf32>
    %36 = vector.multi_reduction <maximumf>, %35, %cst_23 [1] : vector<8x16xf32> to vector<8xf32>
    %37 = vector.shape_cast %36 : vector<8xf32> to vector<8x1xf32>
    %38 = vector.broadcast %37 : vector<8x1xf32> to vector<8x16xf32>
    %39 = arith.subf %35, %38 : vector<8x16xf32>
    %40 = math.exp %39 : vector<8x16xf32>
    %cst_24 = arith.constant dense<0.000000e+00> : vector<8xf32>
    %41 = vector.multi_reduction <add>, %40, %cst_24 [1] : vector<8x16xf32> to vector<8xf32>
    %42 = vector.shape_cast %41 : vector<8xf32> to vector<8x1xf32>
    %43 = tpu.reciprocal %42 : vector<8x1xf32> -> vector<8x1xf32>
    %44 = vector.broadcast %43 : vector<8x1xf32> to vector<8x16xf32>
    %45 = arith.mulf %40, %44 : vector<8x16xf32>
    %cst_25 = arith.constant dense<0.000000e+00> : vector<8x8xf32>
    %46 = tpu.matmul %45, %34, %cst_25 {dimension_numbers = #tpu.dot_dimension_numbers<[1], [0], [0], [1], [0, 0, 1, 1], [], []>} : vector<8x16xf32>, vector<16x8xf32>, vector<8x8xf32> -> vector<8x8xf32>
    %c8 = arith.constant 8 : index
    %c0_26 = arith.constant 0 : index
    %47 = vector.load %arg5[%c8, %c0_26] : memref<32x32xf32, #tpu.memory_space<vmem>>, vector<8x32xf32>
    %cst_27 = arith.constant dense<0.000000e+00> : vector<8x32xf32>
    %48 = tpu.matmul %46, %47, %cst_27 {dimension_numbers = #tpu.dot_dimension_numbers<[1], [0], [0], [1], [0, 0, 1, 1], [], []>} : vector<8x8xf32>, vector<8x32xf32>, vector<8x32xf32> -> vector<8x32xf32>
    %49 = arith.addf %27, %48 : vector<8x32xf32>
    %c2 = arith.constant 2 : index
    %50 = arith.index_cast %4 : i32 to index
    %c0_28 = arith.constant 0 : index
    %51 = vector.load %arg8[%c2, %50, %c0_28] : memref<4x16x8xf32, #tpu.memory_space<vmem>>, vector<1x8x8xf32>
    %52 = vector.shape_cast %51 : vector<1x8x8xf32> to vector<8x8xf32>
    %c2_29 = arith.constant 2 : index
    %c0_30 = arith.constant 0 : index
    %c0_31 = arith.constant 0 : index
    %53 = vector.load %arg9[%c2_29, %c0_30, %c0_31] : memref<4x16x8xf32, #tpu.memory_space<vmem>>, vector<1x16x8xf32>
    %54 = vector.shape_cast %53 : vector<1x16x8xf32> to vector<16x8xf32>
    %c2_32 = arith.constant 2 : index
    %c0_33 = arith.constant 0 : index
    %c0_34 = arith.constant 0 : index
    %55 = vector.load %arg10[%c2_32, %c0_33, %c0_34] : memref<4x16x8xf32, #tpu.memory_space<vmem>>, vector<1x16x8xf32>
    %56 = vector.shape_cast %55 : vector<1x16x8xf32> to vector<16x8xf32>
    %cst_35 = arith.constant dense<0.000000e+00> : vector<8x16xf32>
    %57 = tpu.matmul %52, %54, %cst_35 {dimension_numbers = #tpu.dot_dimension_numbers<[1], [1], [0], [0], [0, 0, 1, 0], [], []>} : vector<8x8xf32>, vector<16x8xf32>, vector<8x16xf32> -> vector<8x16xf32>
    %cst_36 = arith.constant dense<0xFF800000> : vector<8xf32>
    %58 = vector.multi_reduction <maximumf>, %57, %cst_36 [1] : vector<8x16xf32> to vector<8xf32>
    %59 = vector.shape_cast %58 : vector<8xf32> to vector<8x1xf32>
    %60 = vector.broadcast %59 : vector<8x1xf32> to vector<8x16xf32>
    %61 = arith.subf %57, %60 : vector<8x16xf32>
    %62 = math.exp %61 : vector<8x16xf32>
    %cst_37 = arith.constant dense<0.000000e+00> : vector<8xf32>
    %63 = vector.multi_reduction <add>, %62, %cst_37 [1] : vector<8x16xf32> to vector<8xf32>
    %64 = vector.shape_cast %63 : vector<8xf32> to vector<8x1xf32>
    %65 = tpu.reciprocal %64 : vector<8x1xf32> -> vector<8x1xf32>
    %66 = vector.broadcast %65 : vector<8x1xf32> to vector<8x16xf32>
    %67 = arith.mulf %62, %66 : vector<8x16xf32>
    %cst_38 = arith.constant dense<0.000000e+00> : vector<8x8xf32>
    %68 = tpu.matmul %67, %56, %cst_38 {dimension_numbers = #tpu.dot_dimension_numbers<[1], [0], [0], [1], [0, 0, 1, 1], [], []>} : vector<8x16xf32>, vector<16x8xf32>, vector<8x8xf32> -> vector<8x8xf32>
    %c16 = arith.constant 16 : index
    %c0_39 = arith.constant 0 : index
    %69 = vector.load %arg5[%c16, %c0_39] : memref<32x32xf32, #tpu.memory_space<vmem>>, vector<8x32xf32>
    %cst_40 = arith.constant dense<0.000000e+00> : vector<8x32xf32>
    %70 = tpu.matmul %68, %69, %cst_40 {dimension_numbers = #tpu.dot_dimension_numbers<[1], [0], [0], [1], [0, 0, 1, 1], [], []>} : vector<8x8xf32>, vector<8x32xf32>, vector<8x32xf32> -> vector<8x32xf32>
    %71 = arith.addf %49, %70 : vector<8x32xf32>
    %c3 = arith.constant 3 : index
    %72 = arith.index_cast %4 : i32 to index
    %c0_41 = arith.constant 0 : index
    %73 = vector.load %arg8[%c3, %72, %c0_41] : memref<4x16x8xf32, #tpu.memory_space<vmem>>, vector<1x8x8xf32>
    %74 = vector.shape_cast %73 : vector<1x8x8xf32> to vector<8x8xf32>
    %c3_42 = arith.constant 3 : index
    %c0_43 = arith.constant 0 : index
    %c0_44 = arith.constant 0 : index
    %75 = vector.load %arg9[%c3_42, %c0_43, %c0_44] : memref<4x16x8xf32, #tpu.memory_space<vmem>>, vector<1x16x8xf32>
    %76 = vector.shape_cast %75 : vector<1x16x8xf32> to vector<16x8xf32>
    %c3_45 = arith.constant 3 : index
    %c0_46 = arith.constant 0 : index
    %c0_47 = arith.constant 0 : index
    %77 = vector.load %arg10[%c3_45, %c0_46, %c0_47] : memref<4x16x8xf32, #tpu.memory_space<vmem>>, vector<1x16x8xf32>
    %78 = vector.shape_cast %77 : vector<1x16x8xf32> to vector<16x8xf32>
    %cst_48 = arith.constant dense<0.000000e+00> : vector<8x16xf32>
    %79 = tpu.matmul %74, %76, %cst_48 {dimension_numbers = #tpu.dot_dimension_numbers<[1], [1], [0], [0], [0, 0, 1, 0], [], []>} : vector<8x8xf32>, vector<16x8xf32>, vector<8x16xf32> -> vector<8x16xf32>
    %cst_49 = arith.constant dense<0xFF800000> : vector<8xf32>
    %80 = vector.multi_reduction <maximumf>, %79, %cst_49 [1] : vector<8x16xf32> to vector<8xf32>
    %81 = vector.shape_cast %80 : vector<8xf32> to vector<8x1xf32>
    %82 = vector.broadcast %81 : vector<8x1xf32> to vector<8x16xf32>
    %83 = arith.subf %79, %82 : vector<8x16xf32>
    %84 = math.exp %83 : vector<8x16xf32>
    %cst_50 = arith.constant dense<0.000000e+00> : vector<8xf32>
    %85 = vector.multi_reduction <add>, %84, %cst_50 [1] : vector<8x16xf32> to vector<8xf32>
    %86 = vector.shape_cast %85 : vector<8xf32> to vector<8x1xf32>
    %87 = tpu.reciprocal %86 : vector<8x1xf32> -> vector<8x1xf32>
    %88 = vector.broadcast %87 : vector<8x1xf32> to vector<8x16xf32>
    %89 = arith.mulf %84, %88 : vector<8x16xf32>
    %cst_51 = arith.constant dense<0.000000e+00> : vector<8x8xf32>
    %90 = tpu.matmul %89, %78, %cst_51 {dimension_numbers = #tpu.dot_dimension_numbers<[1], [0], [0], [1], [0, 0, 1, 1], [], []>} : vector<8x16xf32>, vector<16x8xf32>, vector<8x8xf32> -> vector<8x8xf32>
    %c24 = arith.constant 24 : index
    %c0_52 = arith.constant 0 : index
    %91 = vector.load %arg5[%c24, %c0_52] : memref<32x32xf32, #tpu.memory_space<vmem>>, vector<8x32xf32>
    %cst_53 = arith.constant dense<0.000000e+00> : vector<8x32xf32>
    %92 = tpu.matmul %90, %91, %cst_53 {dimension_numbers = #tpu.dot_dimension_numbers<[1], [0], [0], [1], [0, 0, 1, 1], [], []>} : vector<8x8xf32>, vector<8x32xf32>, vector<8x32xf32> -> vector<8x32xf32>
    %93 = arith.addf %71, %92 : vector<8x32xf32>
    %c0_54 = arith.constant 0 : index
    %c0_55 = arith.constant 0 : index
    %94 = vector.load %arg6[%c0_54, %c0_55] : memref<1x32xf32, #tpu.memory_space<vmem>>, vector<1x32xf32>
    %95 = vector.broadcast %94 : vector<1x32xf32> to vector<8x32xf32>
    %96 = arith.addf %93, %95 : vector<8x32xf32>
    %c0_56 = arith.constant 0 : index
    %c0_57 = arith.constant 0 : index
    %c0_58 = arith.constant 0 : index
    %97 = vector.load %arg7[%c0_56, %c0_57, %c0_58] : memref<1x8x32xf32, #tpu.memory_space<vmem>>, vector<1x8x32xf32>
    %98 = vector.shape_cast %97 : vector<1x8x32xf32> to vector<8x32xf32>
    %99 = vector.shape_cast %96 : vector<8x32xf32> to vector<1x8x32xf32>
    tpu.vector_store %arg7[%c0_56, %c0_57, %c0_58], %99 {strides = array<i32>} : memref<1x8x32xf32, #tpu.memory_space<vmem>>, vector<1x8x32xf32>,
    return
  }
  func.func @transform_0(%arg0: i32, %arg1: i32) -> (i32, i32, i32) {
    %c0_i32 = arith.constant 0 : i32
    %c0_i32_0 = arith.constant 0 : i32
    %c0_i32_1 = arith.constant 0 : i32
    return %arg0, %c0_i32, %c0_i32_0 : i32, i32, i32
  }
  func.func @transform_1(%arg0: i32, %arg1: i32) -> (i32, i32) {
    %c0_i32 = arith.constant 0 : i32
    %c0_i32_0 = arith.constant 0 : i32
    %c0_i32_1 = arith.constant 0 : i32
    return %c0_i32, %c0_i32_0 : i32, i32
  }
  func.func @transform_2(%arg0: i32, %arg1: i32) -> (i32, i32) {
    %c0_i32 = arith.constant 0 : i32
    %c0_i32_0 = arith.constant 0 : i32
    %c0_i32_1 = arith.constant 0 : i32
    return %c0_i32, %c0_i32_0 : i32, i32
  }
  func.func @transform_3(%arg0: i32, %arg1: i32) -> (i32, i32) {
    %c0_i32 = arith.constant 0 : i32
    %c0_i32_0 = arith.constant 0 : i32
    %c0_i32_1 = arith.constant 0 : i32
    return %c0_i32, %c0_i32_0 : i32, i32
  }
  func.func @transform_4(%arg0: i32, %arg1: i32) -> (i32, i32) {
    %c0_i32 = arith.constant 0 : i32
    %c0_i32_0 = arith.constant 0 : i32
    %c0_i32_1 = arith.constant 0 : i32
    return %c0_i32, %c0_i32_0 : i32, i32
  }
  func.func @transform_5(%arg0: i32, %arg1: i32) -> (i32, i32, i32) {
    %c0_i32 = arith.constant 0 : i32
    %c0_i32_0 = arith.constant 0 : i32
    return %arg0, %arg1, %c0_i32 : i32, i32, i32
  }
}

</mosaic_0001>

<bundles_post_ra>
// kernel: tpu_custom_call.1
= control target key start
LH: loop header
LB: loop body
LE: loop exit
PB: predicated region body
PF: predicated region fallthrough
CT: control target
= control target key end

     0   :  { %s2670_s0 = inlined_call_operand.hbm [shape: f32[2,16,32], index: 0, kind: input, shape index: {}]   ;;  %s2671_s1 = inlined_call_operand.hbm [shape: f32[32,96], index: 1, kind: input, shape index: {}]   ;;  %s2672_s2 = inlined_call_operand.vmem [shape: f32[1,96], index: 2, kind: input, shape index: {}]   ;;  %s2673_s3 = inlined_call_operand.hbm [shape: f32[32,32], index: 3, kind: input, shape index: {}]   ;;  %s2674_s4 = inlined_call_operand.vmem [shape: f32[1,32], index: 4, kind: input, shape index: {}]   ;;  %s2675_s5 = inlined_call_operand.hbm [shape: f32[2,16,32], index: 5, kind: output, shape index: {}]  }
   0x1   :  { %2688 = sst [smem:[#allocation19_spill]] %s2671_s1 }
   0x2   :  { %2689 = sst [smem:[#allocation20_spill]] %s2673_s3 }
   0x3   :  { %2690 = sst [smem:[#allocation21_spill]] %s2674_s4 }
   0x4   :  { %2691 = sst [smem:[#allocation22_spill]] %s2675_s5 }
   0x5   :  { %10 = vsyncpa [#allocation6], 0 }
   0x6   :  { %12 = vsyncpa [#allocation6 + $0x1], 0 }
   0x7   :  { %13 = vsyncpa [#allocation9], 0 }
   0x8   :  { %14 = vsyncpa [#allocation7], 0 }
   0x9   :  { %16 = vsyncpa [#allocation7 + $0x1], 0  ;;  %s2248_s18 = smov 0   ;;  %s2250_s19 = smov 0  }
   0xa   :  { %s2252_s20 = smov 0   ;;  %s2254_s21 = smov 0  }
   0xb   :  { %s2256_s22 = smov 0   ;;  %s2258_s23 = smov 0  }
   0xc   :  { %s2260_s24 = smov 0   ;;  %s2262_s25 = smov 0  }
   0xd   :  { %s2264_s26 = smov 0   ;;  %s2266_s27 = smov 0  }
   0xe   :  { %s2268_s28 = smov 0  }
   0xf LB: > { %2692 = sst [smem:[#allocation15_spill]] %s2156_s18  ;;  %s1616_s29 = sadd.s32 4294967295, %s2196_s28   ;;  %s2196_s28 = sphi %s2268_s28, %s22_s28   ;;  %s2192_s27 = sphi %s2266_s27, %s2731_s27   ;;  %s2188_s26 = sphi %s2264_s26, %s2723_s26   ;;  %s2184_s25 = sphi %s2262_s25, %s2730_s25   ;;  %s2180_s24 = sphi %s2260_s24, %s2722_s24   ;;  %s2176_s23 = sphi %s2258_s23, %s2729_s23   ;;  %s2172_s22 = sphi %s2256_s22, %s2728_s22   ;;  %s2168_s21 = sphi %s2254_s21, %s2727_s21   ;;  %s2164_s20 = sphi %s2252_s20, %s2726_s20   ;;  %s2160_s19 = sphi %s2250_s19, %s2725_s19   ;;  %s2156_s18 = sphi %s2248_s18, %s2724_s18  }
  0x10   : > { %2693 = sst [smem:[#allocation16_spill]] %s2188_s26  ;;  %s1617_s30 = sadd.s32 4294967294, %s2196_s28  }
  0x11   : > { %p54_p0 = scmp.ne.s32.totalorder %s2172_s22, %s2168_s21  ;;  %p2304_p1 = scmp.eq.s32.totalorder %s1616_s29, 0 }
  0x12   : > { %p163_p2 = scmp.ne.s32.totalorder %s2164_s20, %s2160_s19  ;;  %p164_p4 = scmp.eq.s32.totalorder %s1616_s29, 3 }
  0x13   : > { %s2694_s6 = scalar_select %p2304_p1, 1, 0 }
  0x14   : > { %p2313_p3 = por %p2304_p1, %p54_p0  ;;  %p169_p5 = scmp.ne.s32.totalorder %s2160_s19, %s2156_s18 }
  0x15   : > { %p170_p6 = scmp.eq.s32.totalorder %s1617_s30, 3  ;;  %p2319_p7 = por %p164_p4, %p163_p2 }
  0x16   : > { %s2695_s8 = scalar_select %p2313_p3, 1, 0 }
  0x17   : > { %s2696_s9 = scalar_select %p2319_p7, 1, 0 }
  0x18   : > { %p1618_p8 = scmp.ge.s32.totalorder %s2196_s28, 1  ;;  %p2324_p9 = por %p170_p6, %p169_p5 }
  0x19   : > { %p177_p10 = scmp.lt.s32.totalorder %s2196_s28, 5  ;;  %s2198_s12 = smov [#allocation8]  }
  0x1a   : > { %s2697_s10 = scalar_select %p2324_p9, 1, 0 }
  0x1b   : > { %p2329_p11 = pnand %p1618_p8, %p177_p10  ;;  %s189_s13 = sshll.u32 %s2198_s12, 4  ;;  %s190_s13 = int_to_ptr.vmem [resolvable:$true] %s189_s13 }
  0x1c   : > { %2698 = sst [smem:[#allocation17_spill]] %s2697_s10  ;;  %s2199_s15 = smov [#allocation10]  }
  0x1d   : > { %s2699_s11 = scalar_select %p2329_p11, 1, 0 }
  0x1e   : > { %p1841_p12 = pneg %p2329_p11  ;;  %s205_s16 = sshll.u32 %s2199_s15, 4  ;;  %s2341_s16 = int_to_ptr.vmem [resolvable:$true] %s205_s16 }
  0x1f   : > { %s2701_s1 = sld [smem:[#allocation19_spill]] }
  0x20   : > { %p2337_p13 = pnand %p1841_p12, %p2304_p1 }
  0x22   : > { %p1986_p2 = pneg %p2337_p13 }
  0x25   : > { %s1984_s29 = scalar_lea.hbm %s2701_s1, 512 }
  0x26   : > { %p1985_p0 = scmp.ne.s32.totalorder %s2701_s1, %s1984_s29  ;;  %p1991_p6 = scmp.lt.u32.totalorder %s1984_s29, %s2701_s1 }
  0x28   : > { %p1987_p4 = pnand %p1986_p2, %p1985_p0 }
  0x2a   : > { %p1988_p5 = pneg %p1987_p4 }
  0x2c   : > { %p1993_p8 = pnand %p1991_p6, %p1988_p5 }
  0x2e   : > { %1996 = shalt.err (!%p1993_p8)
}
  0x2f   : > { %s1997_s15 = scalar_lea.vmem %s190_s13, 512  ;;  %p2005_p7 = scmp.lt.s32.totalorder %s190_s13, %s190_s13 }
  0x30   : > { %p1998_p10 = scmp.ne.s32.totalorder %s190_s13, %s1997_s15  ;;  %p2006_p1 = scmp.lt.s32.totalorder %s1997_s15, %s1997_s15 }
  0x32   : > { %p2000_p12 = pnand %p1998_p10, %p1986_p2  ;;  %p2007_p3 = por %p2006_p1, %p2005_p7 }
  0x34   : > { %p2001_p9 = pneg %p2000_p12 }
  0x36   : > { %p2008_p11 = pnand %p2007_p3, %p2001_p9 }
  0x38   : > { %2011 = shalt.err (!%p2008_p11)
}
  0x39   : > { %s2684_s17 = smov 128   ;;  %s2685_s21 = smov 8  }
  0x3a   : > { %1844 = dma.hbm_to_vmem [thread:$0]  (!%p2337_p13), %s2701_s1, 512, %s190_s13, [#allocation9], %s2684_s17, %s2684_s17, %s2685_s21  }
  0x3b   : > { %s2702_s3 = sld [smem:[#allocation20_spill]] }
  0x41   : > { %s2012_s12 = scalar_lea.hbm %s2702_s3, 512 }
  0x42   : > { %p2013_p1 = scmp.ne.s32.totalorder %s2702_s3, %s2012_s12  ;;  %p2019_p9 = scmp.lt.u32.totalorder %s2012_s12, %s2702_s3 }
  0x44   : > { %p2015_p3 = pnand %p2013_p1, %p1986_p2 }
  0x46   : > { %p2016_p7 = pneg %p2015_p3 }
  0x48   : > { %p2021_p11 = pnand %p2019_p9, %p2016_p7 }
  0x4a   : > { %2024 = shalt.err (!%p2021_p11)
}
  0x4b   : > { %s2025_s13 = scalar_lea.vmem %s2341_s16, 512  ;;  %p2033_p6 = scmp.lt.s32.totalorder %s2341_s16, %s2341_s16 }
  0x4c   : > { %p2026_p0 = scmp.ne.s32.totalorder %s2341_s16, %s2025_s13  ;;  %p2034_p8 = scmp.lt.s32.totalorder %s2025_s13, %s2025_s13 }
  0x4e   : > { %p2028_p4 = pnand %p2026_p0, %p1986_p2  ;;  %p2035_p10 = por %p2034_p8, %p2033_p6 }
  0x50   : > { %p2029_p5 = pneg %p2028_p4 }
  0x52   : > { %p2036_p12 = pnand %p2035_p10, %p2029_p5 }
  0x54   : > { %2039 = shalt.err (!%p2036_p12)
}
  0x55   : > { %1847 = dma.hbm_to_vmem [thread:$0]  (!%p2337_p13), %s2702_s3, 512, %s2341_s16, [#allocation9], %s2684_s17, %s2684_s17, %s2685_s21  }
  0x56   : > { %s31_s18 = sadd.s32 1, %s2188_s26  ;;  %s34_s14 = sadd.s32 1, %s2192_s27 }
  0x57   : > { %p32_p2 = scmp.ge.s32.totalorder %s31_s18, 2  ;;  %s41_s7 = sadd.s32 1, %s2176_s23 }
  0x58   : > { %p48_p1 = scmp.ne.s32.totalorder %s2176_s23, %s2172_s22  ;;  %p49_p3 = scmp.eq.s32.totalorder %s2196_s28, 0 }
  0x59   : > { %s2733_s18 = smov (%p32_p2, %s31_s18), 0  ;;  %s2735_s14 = smov (!%p32_p2, %s34_s14), %s2192_s27 }
  0x5a   : > { %2703 = sst [smem:[#allocation18_spill]] %s2733_s18  ;;  %p2405_p7 = por %p49_p3, %p48_p1 }
  0x5b   : > { %s149_s29 = ssub.s32 %s2188_s26, %s2733_s18  ;;  %p36_p13 = scmp.ge.s32.totalorder %s2735_s14, 2 }
  0x5c   : > { %p1858_p9 = scmp.lt.s32.totalorder %s2196_s28, 4  ;;  %s222_s16 = sand.u32 1, %s2176_s23  }
  0x5d   : > { %s1667_s30 = sshll.u32 %s2192_s27, 8  ;;  %s2737_s14 = smov (%p36_p13, %s2735_s14), 0 }
  0x5e   : > { %s1622_s12 = sshll.u32 %s222_s16, 4  ;;  %s38_s15 = ssub.s32 %s2192_s27, %s2737_s14 }
  0x5f   : > { %p39_p11 = scmp.eq.s32.totalorder %s38_s15, 0  ;;  %s150_s13 = sor.u32 %s149_s29, %s38_s15 }
  0x60   : > { %p151_p0 = scmp.eq.s32.totalorder %s150_s13, 0  ;;  %s2421_s17 = scalar_lea.hbm %s2670_s0, %s1667_s30 }
  0x61   : > { %s2424_s21 = scalar_select %p39_p11, %s2176_s23, %s41_s7  }
  0x62   : > { %s2705_s1 = sadd.s32 1, %s2164_s20  ;;  %s226_s18 = scalar_lea.vmem [#allocation5], %s1622_s12 }
  0x63   : > { %s2429_s3 = scalar_select %p151_p0, %s2164_s20, %s2705_s1  }
  0x64   : > { %s233_s26 = sshll.u32 %s226_s18, 4  ;;  %p2435_p4 = pnand %p1858_p9, %p2405_p7  ;;  %s2439_s26 = int_to_ptr.vmem [resolvable:$true] %s233_s26 }
  0x65   : > { %s2441_s30 = scalar_lea.sflag [#allocation6], %s222_s16  ;;  %s2040_s7 = scalar_lea.hbm %s2421_s17, 256 }
  0x66   : > { %p2041_p5 = scmp.ne.s32.totalorder %s2421_s17, %s2040_s7  ;;  %p2042_p6 = pneg %p2435_p4 }
  0x67   : > { %s2045_s10 = scalar_lea.hbm %s2670_s0, 512  ;;  %p2046_p12 = scmp.lt.u32.totalorder %s2421_s17, %s2670_s0 }
  0x68   : > { %p2043_p8 = pnand %p2042_p6, %p2041_p5  ;;  %p2047_p2 = scmp.lt.u32.totalorder %s2045_s10, %s2040_s7 }
  0x69   : > { %p2049_p3 = scmp.lt.u32.totalorder %s2040_s7, %s2421_s17 }
  0x6a   : > { %p2044_p10 = pneg %p2043_p8  ;;  %p2048_p1 = por %p2047_p2, %p2046_p12 }
  0x6c   : > { %p2050_p7 = por %p2049_p3, %p2048_p1 }
  0x6e   : > { %p2051_p13 = pnand %p2050_p7, %p2044_p10 }
  0x70   : > { %2054 = shalt.err (!%p2051_p13)
}
  0x71   : > { %s2055_s16 = scalar_lea.vmem %s2439_s26, 256  ;;  %s2202_s13 = smov [#allocation5]  }
  0x72   : > { %p2056_p9 = scmp.ne.s32.totalorder %s2439_s26, %s2055_s16  ;;  %s2060_s4 = sshll.u32 %s2202_s13, 4  ;;  %s2061_s4 = int_to_ptr.vmem [resolvable:$false] %s2060_s4 }
  0x73   : > { %s2062_s5 = scalar_lea.vmem %s2061_s4, 512  ;;  %p2063_p5 = scmp.lt.s32.totalorder %s2439_s26, %s2061_s4 }
  0x74   : > { %p2058_p11 = pnand %p2056_p9, %p2042_p6  ;;  %p2064_p8 = scmp.lt.s32.totalorder %s2062_s5, %s2055_s16 }
  0x76   : > { %p2059_p0 = pneg %p2058_p11  ;;  %p2065_p12 = por %p2064_p8, %p2063_p5 }
  0x78   : > { %p2066_p2 = pnand %p2065_p12, %p2059_p0 }
  0x7a   : > { %2069 = shalt.err (!%p2066_p2)
}
  0x7b   : > { %s2707_s7 = smov 8   ;;  %s2708_s1 = smov 128  }
  0x7c   : > { %1851 = dma.hbm_to_vmem [thread:$0]  (!%p2435_p4), %s2421_s17, 256, %s2439_s26, %s2441_s30, %s2708_s1, %s2708_s1, %s2707_s7  }
  0x7d   : > { %p2709_p6 = scmp.ne.s32.totalorder %s2699_s11, 0 }
  0x7e   : > { %s247_s18 = sand.u32 (!%p2709_p6), 1, %s2172_s22   ;;  %p2710_p10 = scmp.ne.s32.totalorder (!%p2709_p6), %s2695_s8, 0 }
  0x7f   : > { %245 = sbr.rel (%p2709_p6) target bundleno = 2994 (0xbb2), region = 40  ;;  %s1626_s10 = sshll.u32 (!%p2709_p6), %s247_s18, 4 }
  0x80   : > { %s248_s12 = scalar_lea.sflag (!%p2709_p6), [#allocation6], %s247_s18  ;;  %s251_s15 = scalar_lea.vmem (!%p2709_p6), [#allocation5], %s1626_s10 }
  0x86   : > { %2143 = dma.done.wait (%p2710_p10), %s248_s12, 256  }
  0x87   : > { %2145 = vsyncadd (%p2710_p10), %s248_s12, 4294967040  ;;  %p2711_p1 = scmp.ne.s32.totalorder %s2694_s6, 0 }
  0x89   : > { %2147 = dma.done.wait (%p2711_p1), [#allocation9], 1024  }
  0x8a   : > { %2149 = vsyncadd (%p2711_p1), [#allocation9], 4294966272  ;;  %s283_s26 = sand.u32 1, %s2160_s19   ;;  %p1630_p4 = scmp.ne.s32.totalorder %s2180_s24, 0 }
  0x8b   : > { %s2486_s11 = sshll.u32 %s283_s26, 3  ;;  %v292_v0 = vld [vmem:[#allocation8] sm:$0xff] (!%p1630_p4)  ;;  %v293_v1 = vld [vmem:[#allocation8 + $0x8] sm:$0xff] (!%p1630_p4)  ;;  %v294_v2 = vld [vmem:[#allocation8 + $0x10] sm:$0xff] (!%p1630_p4)  ;;  %vm303_vm0 = vcmask (!%p1630_p4), 261120   ;;  %vm387_vm1 = vcmask (!%p1630_p4), 64512  }
  0x8c   : > { %s285_s17 = scalar_lea.vmem [#allocation11], %s2486_s11  ;;  %289 = sbr.rel (%p1630_p4) target bundleno = 520 (0x208), region = 56  ;;  %v1793_v3 = vpack.c.bf16 (!%p1630_p4), %v293_v1, %v292_v0  ;;  %v295_v4 = vld [vmem:[#allocation8 + $0x18] sm:$0xff] (!%p1630_p4)  ;;  %v290_v5 = vld [vmem:[%s251_s15] sm:$0xff] (!%p1630_p4) }
  0x8d   : > { %v1797_v6 = vpack.c.bf16 (!%p1630_p4), %v295_v4, %v294_v2  ;;  %1714 = vmatprep.mubr.msk.f32.mxu0 (!%p1630_p4), %vm303_vm0, %v290_v5  ;;  %v291_v7 = vld [vmem:[%s251_s15 + $0x8] sm:$0xff] (!%p1630_p4)  ;;  %v1631_v8 = vld [vmem:[%s2672_s2] ss:$0 sm:$0xff] (!%p1630_p4)  ;;  %s2203_s29 = smov (!%p1630_p4), 64   ;;  %s2204_s30 = smov (!%p1630_p4), 96  }
  0x8e   : > { %1794 = vmatprep.subr.bf16.mxu0 (!%p1630_p4), %v1793_v3  ;;  %s2205_s16 = smov (!%p1630_p4), 88   ;;  %s2206_s13 = smov (!%p1630_p4), 56  }
  0x8f   : > { %1796 = vmatpush3.bf16.msra.mxu0 (!%p1630_p4), %v1793_v3  ;;  %s2207_s4 = smov (!%p1630_p4), 80   ;;  %s2208_s5 = smov (!%p1630_p4), 48  }
  0x90   : > { %1798 = vmatprep.subr.bf16.mxu0 (!%p1630_p4), %v1797_v6  ;;  %s2209_s7 = smov (!%p1630_p4), 72   ;;  %s2210_s1 = smov (!%p1630_p4), 120  }
  0x91   : > { %s2211_s18 = smov (!%p1630_p4), 112   ;;  %s2212_s10 = smov (!%p1630_p4), 104  }
  0x92   : > { %s2213_s12 = smov (!%p1630_p4), 40  }
  0x93   : > { %1800 = vmatpush3.bf16.msra.mxu0 %v1797_v6 }
  0x96   : > { %1715 = vmatmul.mubr.msk.f32.vlgmr.msra.gmra.mrb[0].mxu0 %vm303_vm0, %v291_v7 }
 0x169   : > { %v1716_v9 = vpop.f32.mrb[0].mxu0 }
 0x16a   : > { %v382_v10 = vadd.f32 %v1716_v9, %v1631_v8  ;;  %v376_v11 = vpop.f32.mrb[1].mxu0 }
 0x16b   : > { %v377_v12 = vadd.f32 %v1631_v8, %v376_v11 }
 0x16c   : > { %402 = vrot.lane.b32.xlu1 %v382_v10, %s2203_s29  ;;  %394 = vrot.lane.b32.xlu0 %v382_v10, %s2204_s30  ;;  %v386_v13 = vmul.f32 0.35355338, %v382_v10 }
 0x16d   : > { %v385_v14 = vmul.f32 0.35355338, %v377_v12 }
 0x16e   : > { %389 = vst.msk [vmem:[#allocation2 + $0x8] sm:$0xff] %vm387_vm1, %v386_v13 }
 0x16f   : > { %388 = vst.msk [vmem:[#allocation2] sm:$0xff] %vm387_vm1, %v385_v14 }
 0x170   : > { %421 = vrot.lane.b32.xlu1 %v382_v10, %s2205_s16  ;;  %392 = vrot.lane.b32.xlu0 %v377_v12, %s2204_s30 }
 0x174   : > { %430 = vrot.lane.b32.xlu1 %v382_v10, %s2206_s13  ;;  %419 = vrot.lane.b32.xlu0 %v377_v12, %s2205_s16 }
 0x178   : > { %448 = vrot.lane.b32.xlu1 %v382_v10, %s2207_s4  ;;  %428 = vrot.lane.b32.xlu0 %v377_v12, %s2206_s13 }
 0x17c   : > { %457 = vrot.lane.b32.xlu1 %v382_v10, %s2208_s5  ;;  %446 = vrot.lane.b32.xlu0 %v377_v12, %s2207_s4 }
 0x180   : > { %475 = vrot.lane.b32.xlu1 %v382_v10, %s2209_s7  ;;  %455 = vrot.lane.b32.xlu0 %v377_v12, %s2208_s5 }
 0x184   : > { %400 = vrot.lane.b32.xlu1 %v377_v12, %s2203_s29  ;;  %473 = vrot.lane.b32.xlu0 %v377_v12, %s2209_s7 }
 0x188   : > { %412 = vrot.lane.b32.xlu1 %v386_v13, %s2210_s1  ;;  %410 = vrot.lane.b32.xlu0 %v385_v14, %s2210_s1 }
 0x18c   : > { %439 = vrot.lane.b32.xlu1 %v386_v13, %s2211_s18  ;;  %437 = vrot.lane.b32.xlu0 %v385_v14, %s2211_s18 }
 0x190   : > { %466 = vrot.lane.b32.xlu1 %v386_v13, %s2212_s10  ;;  %464 = vrot.lane.b32.xlu0 %v385_v14, %s2212_s10 }
 0x194   : > { %484 = vrot.lane.b32.xlu1 %v382_v10, %s2213_s12  ;;  %482 = vrot.lane.b32.xlu0 %v377_v12, %s2213_s12 }
 0x1de   : > { %v403_v15 = vpop.permute.xlu1 %402  ;;  %v395_v16 = vpop.permute.xlu0 %394 }
 0x1df   : > { %407 = vst.msk [vmem:[#allocation4 + $0x8] sm:$0xff] %vm387_vm1, %v403_v15  ;;  %399 = vst.msk [vmem:[#allocation3 + $0x8] sm:$0xff] %vm387_vm1, %v395_v16 }
 0x1e2   : > { %v422_v17 = vpop.permute.xlu1 %421  ;;  %v393_v18 = vpop.permute.xlu0 %392 }
 0x1e3   : > { %427 = vst.msk [vmem:[#allocation3 + $0x18] sm:$0xff] %vm387_vm1, %v422_v17  ;;  %398 = vst.msk [vmem:[#allocation3] sm:$0xff] %vm387_vm1, %v393_v18 }
 0x1e6   : > { %v431_v19 = vpop.permute.xlu1 %430  ;;  %v420_v20 = vpop.permute.xlu0 %419 }
 0x1e7   : > { %436 = vst.msk [vmem:[#allocation4 + $0x18] sm:$0xff] %vm387_vm1, %v431_v19  ;;  %426 = vst.msk [vmem:[#allocation3 + $0x10] sm:$0xff] %vm387_vm1, %v420_v20 }
 0x1ea   : > { %v449_v21 = vpop.permute.xlu1 %448  ;;  %v429_v22 = vpop.permute.xlu0 %428 }
 0x1eb   : > { %454 = vst.msk [vmem:[#allocation3 + $0x28] sm:$0xff] %vm387_vm1, %v449_v21  ;;  %435 = vst.msk [vmem:[#allocation4 + $0x10] sm:$0xff] %vm387_vm1, %v429_v22 }
 0x1ee   : > { %v458_v23 = vpop.permute.xlu1 %457  ;;  %v447_v24 = vpop.permute.xlu0 %446 }
 0x1ef   : > { %463 = vst.msk [vmem:[#allocation4 + $0x28] sm:$0xff] %vm387_vm1, %v458_v23  ;;  %453 = vst.msk [vmem:[#allocation3 + $0x20] sm:$0xff] %vm387_vm1, %v447_v24 }
 0x1f2   : > { %v476_v25 = vpop.permute.xlu1 %475  ;;  %v456_v26 = vpop.permute.xlu0 %455 }
 0x1f3   : > { %481 = vst.msk [vmem:[#allocation3 + $0x38] sm:$0xff] %vm387_vm1, %v476_v25  ;;  %462 = vst.msk [vmem:[#allocation4 + $0x20] sm:$0xff] %vm387_vm1, %v456_v26 }
 0x1f6   : > { %v401_v27 = vpop.permute.xlu1 %400  ;;  %v474_v28 = vpop.permute.xlu0 %473 }
 0x1f7   : > { %406 = vst.msk [vmem:[#allocation4] sm:$0xff] %vm387_vm1, %v401_v27  ;;  %480 = vst.msk [vmem:[#allocation3 + $0x30] sm:$0xff] %vm387_vm1, %v474_v28 }
 0x1fa   : > { %v413_v29 = vpop.permute.xlu1 %412  ;;  %v411_v30 = vpop.permute.xlu0 %410 }
 0x1fb   : > { %418 = vst.msk [vmem:[#allocation2 + $0x18] sm:$0xff] %vm387_vm1, %v413_v29  ;;  %417 = vst.msk [vmem:[#allocation2 + $0x10] sm:$0xff] %vm387_vm1, %v411_v30 }
 0x1fe   : > { %v440_v31 = vpop.permute.xlu1 %439  ;;  %v438_v32 = vpop.permute.xlu0 %437 }
 0x1ff   : > { %445 = vst.msk [vmem:[#allocation2 + $0x28] sm:$0xff] %vm387_vm1, %v440_v31  ;;  %444 = vst.msk [vmem:[#allocation2 + $0x20] sm:$0xff] %vm387_vm1, %v438_v32 }
 0x202   : > { %v467_v33 = vpop.permute.xlu1 %466  ;;  %v465_v34 = vpop.permute.xlu0 %464 }
 0x203   : > { %472 = vst.msk [vmem:[#allocation2 + $0x38] sm:$0xff] %vm387_vm1, %v467_v33  ;;  %471 = vst.msk [vmem:[#allocation2 + $0x30] sm:$0xff] %vm387_vm1, %v465_v34 }
 0x206   : > { %v485_v35 = vpop.permute.xlu1 %484  ;;  %v483_v36 = vpop.permute.xlu0 %482 }
 0x207   : > { %490 = vst.msk [vmem:[#allocation4 + $0x38] sm:$0xff] %vm387_vm1, %v485_v35  ;;  %489 = vst.msk [vmem:[#allocation4 + $0x30] sm:$0xff] %vm387_vm1, %v483_v36 }
 0x208 PF: > { %v494_v37 = vld [vmem:[#allocation3] sm:$0xff]  ;;  %v495_v38 = vld [vmem:[#allocation3 + $0x8] sm:$0xff]  ;;  %vm498_vm2 = vcmask 64512   ;;  %v2214_v39 = vmov 0.0|0.0   ;;  %vm2215_vm4 = vmmov 0   ;;  %v2216_v42 = vmov 0.0  }
 0x209   : > { %1801 = vmatprep.subr.bf16.mxu0 %v2214_v39  ;;  %v1802_v40 = vpack.c.bf16 %v495_v38, %v494_v37  ;;  %vm2520_vm3 = vmpackc.low %vm498_vm2, %vm498_vm2  ;;  %1721 = vmatprep.mubr.msk.f32.mxu0 %vm2215_vm4, %v2216_v42  ;;  %s1634_s15 = sshll.u32 %s2180_s24, 3  ;;  %vm578_vm5 = vcmask 130048   ;;  %v496_v52 = vld [vmem:[#allocation4] sm:$0xff]  ;;  %v497_v53 = vld [vmem:[#allocation4 + $0x8] sm:$0xff]  ;;  %s1663_s8 = sshll.u32 %s2184_s25, 1  ;;  %vm1485_vm6 = vcmask 261120  }
 0x20a   : > { %1805 = vmatprep.subr.bf16.mxu1 %v2214_v39  ;;  %1728 = vmatprep.mubr.msk.f32.mxu1 %vm2215_vm4, %v2216_v42  ;;  %s2533_s6 = scalar_lea.vmem [#allocation2], %s1634_s15  ;;  %v1806_v54 = vpack.c.bf16 %v497_v53, %v496_v52  ;;  %v668_v56 = vld [vmem:[#allocation3 + $0x10] sm:$0xff]  ;;  %v669_v57 = vld [vmem:[#allocation3 + $0x18] sm:$0xff]  ;;  %v663_v62 = vld [vmem:[#allocation10] sm:$0xff]  ;;  %s1499_s29 = sadd.s32 %s2180_s24, %s1663_s8 }
 0x20b   : > { %1804 = vmatpush3.bf16.xpose.msk.msra.mxu0 %vm2520_vm3, %v1802_v40  ;;  %v493_v43 = vld [vmem:[%s2533_s6] sm:$0xff]  ;;  %v1809_v59 = vpack.c.bf16 %v669_v57, %v668_v56  ;;  %v1640_v61 = vld [vmem:[%s2533_s6 + $0x10] sm:$0xff]  ;;  %v672_v10 = vld [vmem:[#allocation4 + $0x18] sm:$0xff]  ;;  %s2714_s13 = sld [smem:[#allocation21_spill]]  ;;  %s1664_s4 = sshll.u32 %s1499_s29, 7 }
 0x20c   : > { %1812 = vmatprep.subr.bf16.mxu0 %v2214_v39  ;;  %1807 = vmatpush3.bf16.msra.mxu1 %v1806_v54  ;;  %v671_v9 = vld [vmem:[#allocation4 + $0x10] sm:$0xff]  ;;  %v836_v17 = vld [vmem:[#allocation10 + $0x8] sm:$0xff]  ;;  %v987_v18 = vld [vmem:[#allocation3 + $0x20] sm:$0xff]  ;;  %s1503_s5 = sshll.u32 %s285_s17, 4  ;;  %s2715_s18 = sld [smem:[#allocation22_spill]]  ;;  %s2606_s5 = int_to_ptr.vmem [resolvable:$true] %s1503_s5 }
 0x20d   : > { %1808 = vmatprep.subr.bf16.mxu1 %v2214_v39  ;;  %v1813_v11 = vpack.c.bf16 %v672_v10, %v671_v9  ;;  %v988_v19 = vld [vmem:[#allocation3 + $0x28] sm:$0xff]  ;;  %v1234_v23 = vld [vmem:[#allocation3 + $0x30] sm:$0xff]  ;;  %v1235_v24 = vld [vmem:[#allocation3 + $0x38] sm:$0xff]  ;;  %s1488_s24 = scalar_lea.sflag [#allocation7], %s283_s26  ;;  %s2070_s25 = scalar_lea.vmem %s2606_s5, 128 }
 0x20e   : > { %v1816_v20 = vpack.c.bf16 %v988_v19, %v987_v18  ;;  %v1648_v25 = vld [vmem:[%s2533_s6 + $0x20] sm:$0xff]  ;;  %v1823_v26 = vpack.c.bf16 %v1235_v24, %v1234_v23  ;;  %v1655_v27 = vld [vmem:[%s2533_s6 + $0x30] sm:$0xff]  ;;  %p2071_p3 = scmp.ne.s32.totalorder %s2606_s5, %s2070_s25  ;;  %p2717_p7 = scmp.ne.s32.totalorder %s2696_s9, 0 }
 0x20f   : > { %v1237_v57 = vld [vmem:[#allocation4 + $0x30] sm:$0xff]  ;;  %s2217_s15 = smov [#allocation11]  }
 0x210   : > { %p2072_p13 = pnand %p2071_p3, %p2717_p7  ;;  %s2074_s6 = sshll.u32 %s2217_s15, 4  ;;  %s2075_s6 = int_to_ptr.vmem [resolvable:$false] %s2074_s6 }
 0x211   : > { %s2076_s8 = scalar_lea.vmem %s2075_s6, 256  ;;  %p2077_p11 = scmp.lt.s32.totalorder %s2606_s5, %s2075_s6 }
 0x212   : > { %1722 = vmatmul.mubr.msk.f32.vlgmr.msra.gmra.mrb[0].mxu0 %vm498_vm2, %v493_v43  ;;  %s2716_s10 = smov %s2715_s18  ;;  %s2604_s12 = scalar_lea.hbm %s2715_s18, %s1664_s4 }
 0x213   : > { %1742 = vmatprep.mubr.msk.f32.mxu0 %vm2215_vm4, %v2216_v42  ;;  %1814 = vmatpush3.bf16.msra.mxu0 %v1813_v11  ;;  %p2073_p9 = pneg %p2072_p13  ;;  %p2078_p0 = scmp.lt.s32.totalorder %s2076_s8, %s2070_s25 }
 0x214   : > { %1745 = vmatprep.subr.mxu0 %v2216_v42 }
 0x215   : > { %p2079_p5 = por %p2078_p0, %p2077_p11 }
 0x217   : > { %p2080_p8 = pnand %p2079_p5, %p2073_p9 }
 0x2e5   : > { %v574_v44 = vpop.f32.mrb[0].mxu0 }
 0x2e6   : > { %v1723_v45 = vpop.f32.mrb[1].mxu0  ;;  %v579_v46 = vsel %vm578_vm5, %v574_v44, -inf }
 0x2e7   : > { %580 = vmax.xlane.f32.xlu0 %v579_v46 }
 0x374   : > { %v581_v47 = vpop.xlane.xlu0 %580 }
 0x375   : > { %v582_v48 = vsub.f32 %v574_v44, %v581_v47 }
 0x377   : > { %v583_v49 = vmul.f32 1.442695, %v582_v48 }
 0x379   : > { %1968 = vpow2.f32 %v583_v49  ;;  %v990_v49 = vld [vmem:[#allocation4 + $0x20] sm:$0xff] }
 0x383   : > { %v1969_v50 = vpop.eup %1968 }
 0x384   : > { %v585_v51 = vsel %vm578_vm5, %v1969_v50, 0.0 }
 0x385   : > { %586 = vadd.xlane.f32.xlu0 %v585_v51 }
 0x412   : > { %v587_v55 = vpop.xlane.xlu0 %586 }
 0x413   : > { %1970 = vrcp.f32 %v587_v55  ;;  %v1155_v55 = vld [vmem:[#allocation10 + $0x10] sm:$0xff] }
 0x41d   : > { %v1971_v58 = vpop.eup %1970 }
 0x41e   : > { %v589_v60 = vmul.f32 %v1971_v58, %v1969_v50  ;;  %v991_v50 = vld [vmem:[#allocation4 + $0x28] sm:$0xff]  ;;  %v1238_v58 = vld [vmem:[#allocation4 + $0x38] sm:$0xff] }
 0x41f   : > { %v1820_v51 = vpack.c.bf16 %v991_v50, %v990_v49 }
 0x420   : > { %1729 = vmatmul.mubr.msk.f32.vlgmr.msra.gmra.mrb[0].mxu1 %vm578_vm5, %v589_v60 }
 0x421   : > { %1811 = vmatpush3.bf16.xpose.msk.msra.mxu1 %vm2520_vm3, %v1809_v59  ;;  %1735 = vmatprep.mubr.msk.f32.mxu1 %vm2215_vm4, %v2216_v42  ;;  %v1827_v59 = vpack.c.bf16 %v1238_v58, %v1237_v57 }
 0x422   : > { %1750 = vmatprep.subr.mxu1 %v2216_v42 }
 0x428   : > { %1736 = vmatmul.mubr.msk.f32.vlgmr.msra.gmra.mrb[2].mxu1 %vm498_vm2, %v1640_v61 }
 0x429   : > { %1752 = vmatprep.mubr.msk.f32.mxu1 %vm2215_vm4, %v2216_v42  ;;  %1751 = vmatpush3.msra.mxu1 %v663_v62 }
 0x42a   : > { %1819 = vmatprep.subr.bf16.mxu1 %v2214_v39 }
 0x4f3   : > { %v659_v63 = vpop.f32.mrb[0].mxu1 }
 0x4f4   : > { %v1730_v0 = vpop.f32.mrb[1].mxu1  ;;  %1753 = vmatmul.mubr.msk.f32.vlgmr.msra.gmra.mrb[4].mxu1 %vm498_vm2, %v659_v63 }
 0x4f5   : > { %1766 = vmatprep.mubr.msk.f32.mxu1 %vm2215_vm4, %v2216_v42  ;;  %1821 = vmatpush3.bf16.msra.mxu1 %v1820_v51 }
 0x4f6   : > { %1769 = vmatprep.subr.mxu1 %v2216_v42 }
 0x4fb   : > { %v748_v1 = vpop.f32.mrb[2].mxu1 }
 0x4fc   : > { %v1737_v2 = vpop.f32.mrb[3].mxu1  ;;  %v752_v3 = vsel %vm578_vm5, %v748_v1, -inf }
 0x4fd   : > { %753 = vmax.xlane.f32.xlu1 %v752_v3 }
 0x58a   : > { %v754_v4 = vpop.xlane.xlu1 %753 }
 0x58b   : > { %v755_v5 = vsub.f32 %v748_v1, %v754_v4 }
 0x58d   : > { %v756_v6 = vmul.f32 1.442695, %v755_v5 }
 0x58f   : > { %1972 = vpow2.f32 %v756_v6  ;;  %v1661_v6 = vld [vmem:[%s2714_s13] ss:$0 sm:$0xff] }
 0x599   : > { %v1973_v7 = vpop.eup %1972 }
 0x59a   : > { %v758_v8 = vsel %vm578_vm5, %v1973_v7, 0.0 }
 0x59b   : > { %759 = vadd.xlane.f32.xlu1 %v758_v8 }
 0x5c7   : > { %v979_v12 = vpop.f32.mrb[4].mxu1 }
 0x5c8   : > { %v1754_v13 = vpop.f32.mrb[5].mxu1 }
 0x628   : > { %v760_v14 = vpop.xlane.xlu1 %759 }
 0x629   : > { %1974 = vrcp.f32 %v760_v14 }
 0x633   : > { %v1975_v15 = vpop.eup %1974 }
 0x634   : > { %v762_v16 = vmul.f32 %v1975_v15, %v1973_v7 }
 0x636   : > { %1743 = vmatmul.mubr.msk.f32.vlgmr.msra.gmra.mrb[2].mxu0 %vm578_vm5, %v762_v16 }
 0x637   : > { %1746 = vmatpush3.msra.mxu0 %v836_v17  ;;  %1747 = vmatprep.mubr.msk.f32.mxu0 %vm2215_vm4, %v2216_v42 }
 0x638   : > { %1815 = vmatprep.subr.bf16.mxu0 %v2214_v39 }
 0x709   : > { %v832_v21 = vpop.f32.mrb[2].mxu0 }
 0x70a   : > { %v1744_v22 = vpop.f32.mrb[3].mxu0  ;;  %1748 = vmatmul.mubr.msk.f32.vlgmr.msra.gmra.mrb[4].mxu0 %vm498_vm2, %v832_v21 }
 0x70b   : > { %1818 = vmatpush3.bf16.xpose.msk.msra.mxu0 %vm2520_vm3, %v1816_v20  ;;  %1759 = vmatprep.mubr.msk.f32.mxu0 %vm2215_vm4, %v2216_v42 }
 0x70c   : > { %1822 = vmatprep.subr.bf16.mxu0 %v2214_v39 }
 0x712   : > { %1760 = vmatmul.mubr.msk.f32.vlgmr.msra.gmra.mrb[6].mxu0 %vm498_vm2, %v1648_v25 }
 0x713   : > { %1825 = vmatpush3.bf16.xpose.msk.msra.mxu0 %vm2520_vm3, %v1823_v26  ;;  %1778 = vmatprep.mubr.msk.f32.mxu0 %vm2215_vm4, %v2216_v42 }
 0x71a   : > { %1779 = vmatmul.mubr.msk.f32.vlgmr.msra.gmra.mrb[8].mxu0 %vm498_vm2, %v1655_v27 }
 0x7dd   : > { %v906_v28 = vpop.f32.mrb[4].mxu0 }
 0x7de   : > { %v980_v29 = vadd.f32 %v979_v12, %v906_v28  ;;  %v1749_v30 = vpop.f32.mrb[5].mxu0 }
 0x7e5   : > { %v1067_v31 = vpop.f32.mrb[6].mxu0 }
 0x7e6   : > { %v1761_v32 = vpop.f32.mrb[7].mxu0  ;;  %v1071_v33 = vsel %vm578_vm5, %v1067_v31, -inf }
 0x7e7   : > { %1072 = vmax.xlane.f32.xlu0 %v1071_v33 }
 0x7ed   : > { %v1314_v34 = vpop.f32.mrb[8].mxu0 }
 0x7ee   : > { %v1318_v35 = vsel %vm578_vm5, %v1314_v34, -inf  ;;  %v1780_v36 = vpop.f32.mrb[9].mxu0 }
 0x7ef   : > { %1319 = vmax.xlane.f32.xlu0 %v1318_v35 }
 0x874   : > { %v1073_v37 = vpop.xlane.xlu0 %1072 }
 0x875   : > { %v1074_v38 = vsub.f32 %v1067_v31, %v1073_v37 }
 0x877   : > { %v1075_v40 = vmul.f32 1.442695, %v1074_v38 }
 0x879   : > { %1976 = vpow2.f32 %v1075_v40 }
 0x87c   : > { %v1320_v41 = vpop.xlane.xlu0 %1319 }
 0x87d   : > { %v1321_v43 = vsub.f32 %v1314_v34, %v1320_v41 }
 0x87f   : > { %v1322_v44 = vmul.f32 1.442695, %v1321_v43 }
 0x881   : > { %1978 = vpow2.f32 %v1322_v44 }
 0x883   : > { %v1977_v45 = vpop.eup %1976 }
 0x884   : > { %v1077_v46 = vsel %vm578_vm5, %v1977_v45, 0.0 }
 0x885   : > { %1078 = vadd.xlane.f32.xlu1 %v1077_v46 }
 0x88b   : > { %v1979_v47 = vpop.eup %1978 }
 0x88c   : > { %v1324_v48 = vsel %vm578_vm5, %v1979_v47, 0.0 }
 0x88d   : > { %1325 = vadd.xlane.f32.xlu1 %v1324_v48 }
 0x912   : > { %v1079_v52 = vpop.xlane.xlu1 %1078 }
 0x913   : > { %1980 = vrcp.f32 %v1079_v52 }
 0x91a   : > { %v1326_v56 = vpop.xlane.xlu1 %1325 }
 0x91b   : > { %1982 = vrcp.f32 %v1326_v56 }
 0x91d   : > { %v1981_v53 = vpop.eup %1980 }
 0x91e   : > { %v1081_v54 = vmul.f32 %v1981_v53, %v1977_v45 }
 0x920   : > { %1767 = vmatmul.mubr.msk.f32.vlgmr.msra.gmra.mrb[6].mxu1 %vm578_vm5, %v1081_v54 }
 0x921   : > { %1770 = vmatpush3.msra.mxu1 %v1155_v55  ;;  %1771 = vmatprep.mubr.msk.f32.mxu1 %vm2215_vm4, %v2216_v42 }
 0x922   : > { %1826 = vmatprep.subr.bf16.mxu1 %v2214_v39  ;;  %v1402_v39 = vld [vmem:[#allocation10 + $0x18] sm:$0xff] }
 0x925   : > { %v1983_v60 = vpop.eup %1982 }
 0x926   : > { %v1328_v63 = vmul.f32 %v1983_v60, %v1979_v47 }
 0x9f3   : > { %v1151_v61 = vpop.f32.mrb[6].mxu1 }
 0x9f4   : > { %v1768_v62 = vpop.f32.mrb[7].mxu1  ;;  %1772 = vmatmul.mubr.msk.f32.vlgmr.msra.gmra.mrb[8].mxu1 %vm498_vm2, %v1151_v61 }
 0x9f5   : > { %1828 = vmatpush3.bf16.msra.mxu1 %v1827_v59  ;;  %1785 = vmatprep.mubr.msk.f32.mxu1 %vm2215_vm4, %v2216_v42 }
 0x9f6   : > { %1788 = vmatprep.subr.mxu1 %v2216_v42 }
 0x9f8   : > { %1786 = vmatmul.mubr.msk.f32.vlgmr.msra.gmra.mrb[10].mxu1 %vm578_vm5, %v1328_v63 }
 0x9f9   : > { %1790 = vmatprep.mubr.msk.f32.mxu1 %vm2215_vm4, %v2216_v42  ;;  %1789 = vmatpush3.msra.mxu1 %v1402_v39 }
 0xac7   : > { %v1225_v0 = vpop.f32.mrb[8].mxu1 }
 0xac8   : > { %v1229_v1 = vadd.f32 %v1225_v0, %v980_v29  ;;  %v1773_v2 = vpop.f32.mrb[9].mxu1 }
 0xacb   : > { %v1398_v3 = vpop.f32.mrb[10].mxu1 }
 0xacc   : > { %v1787_v4 = vpop.f32.mrb[11].mxu1  ;;  %1791 = vmatmul.mubr.msk.f32.vlgmr.msra.gmra.mrb[12].mxu1 %vm498_vm2, %v1398_v3 }
 0xb9f   : > { %v1472_v5 = vpop.f32.mrb[12].mxu1 }
 0xba0   : > { %v1476_v42 = vadd.f32 %v1472_v5, %v1229_v1  ;;  %v1792_v7 = vpop.f32.mrb[13].mxu1 }
 0xba2   : > { %v1484_v8 = vadd.f32 %v1661_v6, %v1476_v42 }
 0xba4   : > { %1486 = vst.msk [vmem:[%s285_s17] sm:$0xff] %vm1485_vm6, %v1484_v8 }
 0xba5   : > { %2083 = shalt.err (!%p2080_p8)
}
 0xba6   : > { %s2084_s26 = scalar_lea.hbm %s2604_s12, 128  ;;  %s2088_s29 = scalar_lea.hbm %s2716_s10, 512 }
 0xba7   : > { %p2085_p12 = scmp.ne.s32.totalorder %s2604_s12, %s2084_s26  ;;  %p2089_p10 = scmp.lt.u32.totalorder %s2604_s12, %s2716_s10 }
 0xba8   : > { %p2090_p1 = scmp.lt.u32.totalorder %s2088_s29, %s2084_s26  ;;  %p2092_p3 = scmp.lt.u32.totalorder %s2084_s26, %s2604_s12 }
 0xba9   : > { %p2086_p2 = pnand %p2085_p12, %p2717_p7 }
 0xbaa   : > { %p2091_p4 = por %p2090_p1, %p2089_p10 }
 0xbab   : > { %p2087_p6 = pneg %p2086_p2 }
 0xbac   : > { %p2093_p13 = por %p2092_p3, %p2091_p4 }
 0xbae   : > { %p2094_p9 = pnand %p2093_p13, %p2087_p6 }
 0xbb0   : > { %2097 = shalt.err (!%p2094_p9)
}
 0xbb1   : > { %1839 = dma.vmem_to_hbm [thread:$0]  (%p2717_p7), %s2606_s5, 128, %s2604_s12, %s1488_s24  }
 0xbb2 PF: > { %s2718_s13 = sld [smem:[#allocation15_spill]]  ;;  %s2719_s4 = sld [smem:[#allocation17_spill]] }
 0xbb3   : > { %p1861_p11 = scmp.ge.s32.totalorder %s2196_s28, 2 }
 0xbb8   : > { %s1515_s7 = sand.u32 1, %s2718_s13   ;;  %p2720_p0 = scmp.ne.s32.totalorder %s2719_s4, 0 }
 0xbb9   : > { %s1516_s1 = scalar_lea.sflag [#allocation7], %s1515_s7 }
 0xbba   : > { %p1853_p5 = pnand %p1861_p11, %p2720_p0 }
 0xbbc   : > { %2151 = dma.done.wait (!%p1853_p5), %s1516_s1, 128  }
 0xbbd   : > { %2153 = vsyncadd (!%p1853_p5), %s1516_s1, 4294967168  ;;  %s22_s28 = sadd.s32 1, %s2196_s28   ;;  %s2721_s9 = smov %s2424_s21 }
 0xbbe   : > { %p19_p8 = scmp.ge.s32.totalorder %s22_s28, 6   ;;  %s2722_s24 = sld [smem:[#allocation16_spill]] }
 0xbbf   : > { %s2723_s26 = sld [smem:[#allocation18_spill]]  ;;  %s2724_s18 = smov %s2160_s19 }
 0xbc0   : > { %s2725_s19 = smov %s2164_s20  ;;  %s2726_s20 = smov %s2429_s3 }
 0xbc1   : > { %s2727_s21 = smov %s2172_s22  ;;  %s2728_s22 = smov %s2176_s23 }
 0xbc2   : > { %s2729_s23 = smov %s2721_s9  ;;  %s2730_s25 = smov %s2192_s27 }
 0xbc3   : > { %s2731_s27 = smov %s2737_s14  ;;  %21 = sbr.rel (!%p19_p8) target bundleno = 15 (0xf), region = 116 }
 0xbca   :  { %1521 = vsyncpa [#allocation6], 1 }
 0xbcb   :  { %1523 = vsyncpa [#allocation6 + $0x1], 1 }
 0xbcc   :  { %1524 = vsyncpa [#allocation9], 1 }
 0xbcd   :  { %1525 = vsyncpa [#allocation7], 1 }
 0xbce   :  { %1527 = vsyncpa [#allocation7 + $0x1], 1 }

</bundles_post_ra>
